<compile_context>
chip_gen: v6e
topology: v6e:2x2x1
jax: 0.10.0
libtpu: 0.0.40
codegen_flags: <defaults>
</compile_context>

<pallas_src>
import functools

import jax
import jax.numpy as jnp
from jax.experimental import pallas as pl
from jax.experimental.pallas import tpu as pltpu

_LANE = 128


def _mlp_kernel(x_ref, w1_ref, b1_ref, w2_ref, b2_ref, w3_ref, b3_ref, o_ref):
    """One lane-dense batch tile of the fused 3-layer MLP.

    x_ref : (S, TB)            (batch on lanes)
    w1_ref: (H, S)   b1_ref: (H, 1)
    w2_ref: (H, H)   b2_ref: (H, 1)
    w3_ref: (1, H)   b3_ref: (1, 1)
    o_ref : (1, TB)            (lane-dense, unmasked store)
    """
    # Layer 1: (H,S) @ (S,TB) -> (H,TB), f32 MXU accumulate, bias bcast on lanes.
    h = jnp.dot(w1_ref[...], x_ref[...], preferred_element_type=jnp.float32)
    h = jnp.maximum(h + b1_ref[...], 0.0)

    # Layer 2: (H,H) @ (H,TB) -> (H,TB)
    h = jnp.dot(w2_ref[...], h, preferred_element_type=jnp.float32)
    h = jnp.maximum(h + b2_ref[...], 0.0)

    # Layer 3: (1,H) @ (H,TB) -> (1,TB); lane-dense output row.
    y = jnp.dot(w3_ref[...], h, preferred_element_type=jnp.float32)
    o_ref[...] = (y + b3_ref[...]).astype(o_ref.dtype)


def value_estimator_forward(x, params, *, tile_b=2048, max_single_tile=4096):
    """Fused 3-layer MLP forward (value head).

    x      : (B, state_dim) float32 states.
    params : (w1 (H,S), b1 (H,1), w2 (H,H), b2 (H,1), w3 (1,H), b3 (1,1))
             -- PyTorch-native (out, in) weight layout.
    Returns (B, 1) float32.
    """
    w1, b1, w2, b2, w3, b3 = params
    B, S = x.shape
    H = w1.shape[0]

    # Tile selection: single padded-to-128 tile for typical batches; for very
    # large B, an even number of ~tile_b-wide tiles (v7x dual-TC balance).
    if B <= max_single_tile:
        tb = max(_LANE, pl.cdiv(B, _LANE) * _LANE)
        num_tiles = 1
    else:
        num_tiles = 2 * pl.cdiv(B, 2 * tile_b)
        tb = pl.cdiv(B, num_tiles * _LANE) * _LANE
    b_pad = tb * num_tiles

    # Batch-on-lanes layout; pad only the (tiny) transposed view's lane dim.
    xt = x.T                                    # (S, B)
    if b_pad != B:
        xt = jnp.pad(xt, ((0, 0), (0, b_pad - B)))

    cost = pl.CostEstimate(
        flops=2 * b_pad * (S * H + H * H + H),
        transcendentals=0,
        bytes_accessed=4 * (S * b_pad            # x stream
                            + S * H + H * H + H  # weights (resident, read once)
                            + 2 * H + 1           # biases
                            + b_pad),             # output row
    )

    resident = lambda a: pl.BlockSpec(a.shape, lambda i: (0, 0))

    out = pl.pallas_call(
        _mlp_kernel,
        out_shape=jax.ShapeDtypeStruct((1, b_pad), jnp.float32),
        grid=(num_tiles,),
        in_specs=[
            pl.BlockSpec((S, tb), lambda i: (0, i)),   # x: lane-dense batch tiles
            resident(w1), resident(b1),                # weights/biases: resident
            resident(w2), resident(b2),
            resident(w3), resident(b3),
        ],
        out_specs=pl.BlockSpec((1, tb), lambda i: (0, i)),  # lane-dense output row
        compiler_params=pltpu.CompilerParams(
            dimension_semantics=("parallel",),
            vmem_limit_bytes=16 * 1024 * 1024,
        ),
        cost_estimate=cost,
    )(xt, w1, b1, w2, b2, w3, b3)

    return out[0, :B].reshape(B, 1)


def init_params(key, state_dim, hidden_dim, output_dim=1):
    """PyTorch-Linear-style init U(-1/sqrt(fan_in), 1/sqrt(fan_in)).

    Weights kept in PyTorch-native (out_features, in_features) layout and
    biases as (out_features, 1) columns -- exactly what the batch-on-lanes
    kernel consumes."""
    assert output_dim == 1, "lane-dense layer-3 path assumes output_dim == 1"
    ks = jax.random.split(key, 6)

    def lin(kw, kb, fan_in, fan_out):
        bound = 1.0 / jnp.sqrt(jnp.float32(fan_in))
        w = jax.random.uniform(kw, (fan_out, fan_in), jnp.float32, -bound, bound)
        b = jax.random.uniform(kb, (fan_out, 1), jnp.float32, -bound, bound)
        return w, b

    w1, b1 = lin(ks[0], ks[1], state_dim, hidden_dim)
    w2, b2 = lin(ks[2], ks[3], hidden_dim, hidden_dim)
    w3, b3 = lin(ks[4], ks[5], hidden_dim, output_dim)
    return (w1, b1, w2, b2, w3, b3)


def reference_forward(x, params):
    w1, b1, w2, b2, w3, b3 = params
    h = jnp.maximum(x @ w1.T + b1.T, 0.0)
    h = jnp.maximum(h @ w2.T + b2.T, 0.0)
    return h @ w3.T + b3.T


if __name__ == "__main__":
    key = jax.random.PRNGKey(0)
    k_x, k_p, k_x2 = jax.random.split(key, 3)

    state_dim = 4     # GridWorld state feature dim
    hidden_dim = 32
    output_dim = 1
    params = init_params(k_p, state_dim, hidden_dim, output_dim)

    fwd = jax.jit(functools.partial(value_estimator_forward))

    # Small batch (typical single-trajectory GridWorld usage) -> one 128-lane tile.
    x_small = jax.random.normal(k_x, (2, state_dim), jnp.float32)
    out_small = jax.block_until_ready(fwd(x_small, params))
    ref_small = reference_forward(x_small, params)
    assert out_small.shape == (2, output_dim)
    assert jnp.allclose(out_small, ref_small, atol=1e-4, rtol=1e-4), "small-batch mismatch"

    # Larger batch: exercises lane padding (600 -> 640) while staying a single
    # grid step with resident weights and a lane-dense output store.
    x_big = jax.random.normal(k_x2, (600, state_dim), jnp.float32)
    out_big = jax.block_until_ready(fwd(x_big, params))
    ref_big = reference_forward(x_big, params)
    assert out_big.shape == (600, output_dim)
    assert jnp.allclose(out_big, ref_big, atol=1e-4, rtol=1e-4), "large-batch mismatch"

    print("KERNEL_OK")
</pallas_src>

<mosaic_0001>
module attributes {stable_mosaic.version = 11 : i64} {
  func.func @_mlp_kernel(%arg0: i32, %arg1: memref<4x128xf32, #tpu.memory_space<vmem>>, %arg2: memref<32x4xf32, #tpu.memory_space<vmem>>, %arg3: memref<32x1xf32, #tpu.memory_space<vmem>>, %arg4: memref<32x32xf32, #tpu.memory_space<vmem>>, %arg5: memref<32x1xf32, #tpu.memory_space<vmem>>, %arg6: memref<1x32xf32, #tpu.memory_space<vmem>>, %arg7: memref<1x1xf32, #tpu.memory_space<vmem>>, %arg8: memref<1x128xf32, #tpu.memory_space<vmem>>) attributes {dimension_semantics = [#tpu.dimension_semantics<parallel>], iteration_bounds = array<i64: 1>, scalar_prefetch = 0 : i64, scratch_operands = 0 : i64, tpu.core_type = #tpu.core_type<tc>, window_params = [{transform_indices = @transform_0, window_bounds = array<i64: 4, 128>}, {pipeline_mode = #tpu.pipeline_mode<synchronous>, transform_indices = @transform_1, window_bounds = array<i64: 32, 4>}, {pipeline_mode = #tpu.pipeline_mode<synchronous>, transform_indices = @transform_2, window_bounds = array<i64: 32, 1>}, {pipeline_mode = #tpu.pipeline_mode<synchronous>, transform_indices = @transform_3, window_bounds = array<i64: 32, 32>}, {pipeline_mode = #tpu.pipeline_mode<synchronous>, transform_indices = @transform_4, window_bounds = array<i64: 32, 1>}, {pipeline_mode = #tpu.pipeline_mode<synchronous>, transform_indices = @transform_5, window_bounds = array<i64: 1, 32>}, {pipeline_mode = #tpu.pipeline_mode<synchronous>, transform_indices = @transform_6, window_bounds = array<i64: 1, 1>}, {transform_indices = @transform_7, window_bounds = array<i64: 1, 128>}]} {
    %c0 = arith.constant 0 : index
    %c0_0 = arith.constant 0 : index
    %0 = vector.load %arg2[%c0, %c0_0] : memref<32x4xf32, #tpu.memory_space<vmem>>, vector<32x4xf32>
    %c0_1 = arith.constant 0 : index
    %c0_2 = arith.constant 0 : index
    %1 = vector.load %arg1[%c0_1, %c0_2] : memref<4x128xf32, #tpu.memory_space<vmem>>, vector<4x128xf32>
    %cst = arith.constant dense<0.000000e+00> : vector<32x128xf32>
    %2 = tpu.matmul %0, %1, %cst {dimension_numbers = #tpu.dot_dimension_numbers<[1], [0], [0], [1], [0, 0, 1, 1], [], []>} : vector<32x4xf32>, vector<4x128xf32>, vector<32x128xf32> -> vector<32x128xf32>
    %c0_3 = arith.constant 0 : index
    %c0_4 = arith.constant 0 : index
    %3 = vector.load %arg3[%c0_3, %c0_4] : memref<32x1xf32, #tpu.memory_space<vmem>>, vector<32x1xf32>
    %4 = vector.broadcast %3 : vector<32x1xf32> to vector<32x128xf32>
    %5 = arith.addf %2, %4 : vector<32x128xf32>
    %cst_5 = arith.constant 0.000000e+00 : f32
    %6 = vector.broadcast %cst_5 : f32 to vector<32x128xf32>
    %7 = arith.maximumf %5, %6 : vector<32x128xf32>
    %c0_6 = arith.constant 0 : index
    %c0_7 = arith.constant 0 : index
    %8 = vector.load %arg4[%c0_6, %c0_7] : memref<32x32xf32, #tpu.memory_space<vmem>>, vector<32x32xf32>
    %cst_8 = arith.constant dense<0.000000e+00> : vector<32x128xf32>
    %9 = tpu.matmul %8, %7, %cst_8 {dimension_numbers = #tpu.dot_dimension_numbers<[1], [0], [0], [1], [0, 0, 1, 1], [], []>} : vector<32x32xf32>, vector<32x128xf32>, vector<32x128xf32> -> vector<32x128xf32>
    %c0_9 = arith.constant 0 : index
    %c0_10 = arith.constant 0 : index
    %10 = vector.load %arg5[%c0_9, %c0_10] : memref<32x1xf32, #tpu.memory_space<vmem>>, vector<32x1xf32>
    %11 = vector.broadcast %10 : vector<32x1xf32> to vector<32x128xf32>
    %12 = arith.addf %9, %11 : vector<32x128xf32>
    %cst_11 = arith.constant 0.000000e+00 : f32
    %13 = vector.broadcast %cst_11 : f32 to vector<32x128xf32>
    %14 = arith.maximumf %12, %13 : vector<32x128xf32>
    %c0_12 = arith.constant 0 : index
    %c0_13 = arith.constant 0 : index
    %15 = vector.load %arg6[%c0_12, %c0_13] : memref<1x32xf32, #tpu.memory_space<vmem>>, vector<1x32xf32>
    %cst_14 = arith.constant dense<0.000000e+00> : vector<1x128xf32>
    %16 = tpu.matmul %15, %14, %cst_14 {dimension_numbers = #tpu.dot_dimension_numbers<[1], [0], [0], [1], [0, 0, 1, 1], [], []>} : vector<1x32xf32>, vector<32x128xf32>, vector<1x128xf32> -> vector<1x128xf32>
    %c0_15 = arith.constant 0 : index
    %c0_16 = arith.constant 0 : index
    %17 = vector.load %arg7[%c0_15, %c0_16] : memref<1x1xf32, #tpu.memory_space<vmem>>, vector<1x1xf32>
    %18 = vector.broadcast %17 : vector<1x1xf32> to vector<1x128xf32>
    %19 = arith.addf %16, %18 : vector<1x128xf32>
    %c0_17 = arith.constant 0 : index
    %c0_18 = arith.constant 0 : index
    %20 = vector.load %arg8[%c0_17, %c0_18] : memref<1x128xf32, #tpu.memory_space<vmem>>, vector<1x128xf32>
    tpu.vector_store %arg8[%c0_17, %c0_18], %19 {strides = array<i32>} : memref<1x128xf32, #tpu.memory_space<vmem>>, vector<1x128xf32>,
    return
  }
  func.func @transform_0(%arg0: i32) -> (i32, i32) {
    %c0_i32 = arith.constant 0 : i32
    %c0_i32_0 = arith.constant 0 : i32
    return %c0_i32, %arg0 : i32, i32
  }
  func.func @transform_1(%arg0: i32) -> (i32, i32) {
    %c0_i32 = arith.constant 0 : i32
    %c0_i32_0 = arith.constant 0 : i32
    %c0_i32_1 = arith.constant 0 : i32
    return %c0_i32, %c0_i32_0 : i32, i32
  }
  func.func @transform_2(%arg0: i32) -> (i32, i32) {
    %c0_i32 = arith.constant 0 : i32
    %c0_i32_0 = arith.constant 0 : i32
    %c0_i32_1 = arith.constant 0 : i32
    return %c0_i32, %c0_i32_0 : i32, i32
  }
  func.func @transform_3(%arg0: i32) -> (i32, i32) {
    %c0_i32 = arith.constant 0 : i32
    %c0_i32_0 = arith.constant 0 : i32
    %c0_i32_1 = arith.constant 0 : i32
    return %c0_i32, %c0_i32_0 : i32, i32
  }
  func.func @transform_4(%arg0: i32) -> (i32, i32) {
    %c0_i32 = arith.constant 0 : i32
    %c0_i32_0 = arith.constant 0 : i32
    %c0_i32_1 = arith.constant 0 : i32
    return %c0_i32, %c0_i32_0 : i32, i32
  }
  func.func @transform_5(%arg0: i32) -> (i32, i32) {
    %c0_i32 = arith.constant 0 : i32
    %c0_i32_0 = arith.constant 0 : i32
    %c0_i32_1 = arith.constant 0 : i32
    return %c0_i32, %c0_i32_0 : i32, i32
  }
  func.func @transform_6(%arg0: i32) -> (i32, i32) {
    %c0_i32 = arith.constant 0 : i32
    %c0_i32_0 = arith.constant 0 : i32
    %c0_i32_1 = arith.constant 0 : i32
    return %c0_i32, %c0_i32_0 : i32, i32
  }
  func.func @transform_7(%arg0: i32) -> (i32, i32) {
    %c0_i32 = arith.constant 0 : i32
    %c0_i32_0 = arith.constant 0 : i32
    return %c0_i32, %arg0 : i32, i32
  }
}

</mosaic_0001>

<bundles_post_ra>
// kernel: value_estimator_forward.1
= control target key start
LH: loop header
LB: loop body
LE: loop exit
PB: predicated region body
PF: predicated region fallthrough
CT: control target
= control target key end

     0   :  { %vm70_vm0 = vcmask 1043456   ;;  %vm57_vm1 = vcmask 31744   ;;  %v448_v3 = vmov 0   ;;  %vm191_vm2 = vcmask 261120   ;;  %s562_s0 = inlined_call_operand.vmem [shape: f32[4,128], index: 0, kind: input, shape index: {}]   ;;  %s563_s1 = inlined_call_operand.vmem [shape: f32[32,4], index: 1, kind: input, shape index: {}]   ;;  %s564_s2 = inlined_call_operand.vmem [shape: f32[32,1], index: 2, kind: input, shape index: {}]   ;;  %s565_s6 = inlined_call_operand.<no memory space> [shape: f32[1,1], index: 6, kind: input, shape index: {}]   ;;  %s566_s4 = inlined_call_operand.vmem [shape: f32[32,1], index: 4, kind: input, shape index: {}]   ;;  %s567_s3 = inlined_call_operand.vmem [shape: f32[32,32], index: 3, kind: input, shape index: {}]   ;;  %s568_s5 = inlined_call_operand.vmem [shape: f32[1,32], index: 5, kind: input, shape index: {}]   ;;  %s569_s7 = inlined_call_operand.vmem [shape: f32[1,128], index: 7, kind: output, shape index: {}]  }
   0x1   :  { %v32_v0 = vld [vmem:[%s562_s0] sm:$0xf]  ;;  %v29_v2 = vld [vmem:[%s563_s1 + $0x8] sm:$0xff]  ;;  %446 = vset.pattern.permute.xlu0 %v448_v3  ;;  %447 = vset.pattern.permute.xlu1 %v448_v3  ;;  %v12_v4 = vstv %s565_s6  ;;  %v30_v5 = vld [vmem:[%s563_s1 + $0x10] sm:$0xff]  ;;  %v449_v36 = vmov 0.0   ;;  %vm450_vm3 = vmmov 0   ;;  %v300_v54 = vlaneseq }
   0x2   :  { %v28_v1 = vld [vmem:[%s563_s1] sm:$0xff]  ;;  %410 = vmatprep.subr.msk.mxu0 %vm70_vm0, %v32_v0  ;;  %v36_v6 = vld [vmem:[%s564_s2 + $0x18] sm:$0xff]  ;;  %13 = vst [vmem:[#allocation2] sm:$0x1] %v12_v4  ;;  %v34_v7 = vld [vmem:[%s564_s2 + $0x8] sm:$0xff] }
   0x3   :  { %412 = vmatprep.mubr.msk.f32.mxu0 %vm57_vm1, %v28_v1  ;;  %411 = vmatpush3.msk.msra.mxu0 %vm70_vm0, %v32_v0  ;;  %v35_v8 = vld [vmem:[%s564_s2 + $0x10] sm:$0xff]  ;;  %v31_v9 = vld [vmem:[%s563_s1 + $0x18] sm:$0xff]  ;;  %v33_v10 = vld [vmem:[%s564_s2] sm:$0xff]  ;;  %v301_v55 = vshrl.u32 %v300_v54, 7 }
   0x4   :  { %54 = vperm.xlu0 %446, %v36_v6   ;;  %413 = vmatmul.mubr.msk.f32.vlgmr.msra.gmra.mxu0 %vm57_vm1, %v29_v2  ;;  %v170_v11 = vld [vmem:[%s566_s4 + $0x18] sm:$0xff]  ;;  %v169_v12 = vld [vmem:[%s566_s4 + $0x10] sm:$0xff]  ;;  %v168_v13 = vld [vmem:[%s566_s4 + $0x8] sm:$0xff] }
   0x5   :  { %44 = vperm.xlu1 %447, %v34_v7   ;;  %415 = vmatprep.mubr.msk.f32.mxu0 %vm57_vm1, %v30_v5  ;;  %v167_v14 = vld [vmem:[%s566_s4] sm:$0xff]  ;;  %v164_v33 = vld [vmem:[%s567_s3 + $0x8] sm:$0xff]  ;;  %v165_v34 = vld [vmem:[%s567_s3 + $0x10] sm:$0xff]  ;;  %v302_v56 = vsub.s32 0, %v301_v55 }
   0x6   :  { %v163_v16 = vld [vmem:[%s567_s3] sm:$0xff]  ;;  %v166_v35 = vld [vmem:[%s567_s3 + $0x18] sm:$0xff]  ;;  %432 = vmatprep.subr.mxu0 %v449_v36 }
   0x7   :  { %426 = vmatprep.mubr.msk.f32.mxu1 %vm191_vm2, %v163_v16  ;;  %v293_v53 = vld [vmem:[%s568_s5] sm:$0x1] }
   0x8   :  { %49 = vperm.xlu0 %446, %v35_v8   ;;  %416 = vmatmul.mubr.msk.f32.gmra.mxu0 %vm57_vm1, %v31_v9 }
   0x9   :  { %39 = vperm.xlu1 %447, %v33_v10   ;;  %v294_v15 = vld [vmem:[#allocation2] sm:$0x1]  ;;  %440 = vmatprep.mubr.msk.f32.mxu0 %vm450_vm3, %v449_v36 }
   0xc   :  { %188 = vperm.xlu0 %446, %v170_v11  }
   0xd   :  { %183 = vperm.xlu1 %447, %v169_v12  }
  0x10   :  { %178 = vperm.xlu0 %446, %v168_v13  }
  0x11   :  { %173 = vperm.xlu1 %447, %v167_v14  }
  0x14   :  { %297 = vperm.xlu0 %446, %v294_v15  }
  0x7f   :  { %v55_v17 = vpop.permute.xlu0 %54 }
  0x80   :  { %v45_v19 = vpop.permute.xlu1 %44 }
  0x83   :  { %v50_v23 = vpop.permute.xlu0 %49 }
  0x84   :  { %v40_v28 = vpop.permute.xlu1 %39 }
  0x87   :  { %v189_v37 = vpop.permute.xlu0 %188 }
  0x88   :  { %v184_v39 = vpop.permute.xlu1 %183 }
  0x8b   :  { %v179_v43 = vpop.permute.xlu0 %178 }
  0x8c   :  { %v174_v48 = vpop.permute.xlu1 %173 }
  0x8f   :  { %v298_v57 = vpop.permute.xlu0 %297 }
  0x90   :  { %v303_v58 = vrot.slane %v298_v57, %v302_v56 }
  0xc4   :  { %v414_v18 = vpop.f32.mrf.mxu0 }
  0xc5   :  { %v146_v25 = vadd.f32 %v414_v18, %v45_v19 }
  0xc6   :  { %v140_v20 = vpop.f32.mrf.mxu0 }
  0xc7   :  { %v141_v29 = vadd.f32 %v140_v20, %v40_v28  ;;  %v160_v31 = vmax.f32 %v146_v25, 0.0 }
  0xc8   :  { %v417_v21 = vpop.f32.mrf.mxu0 }
  0xc9   :  { %v156_v22 = vadd.f32 %v417_v21, %v55_v17  ;;  %v159_v32 = vmax.f32 %v141_v29, 0.0 }
  0xca   :  { %v150_v24 = vpop.f32.mrf.mxu0 }
  0xcb   :  { %v162_v26 = vmax.f32 %v156_v22, 0.0  ;;  %v151_v27 = vadd.f32 %v150_v24, %v50_v23 }
  0xcd   :  { %v161_v30 = vmax.f32 %v151_v27, 0.0  ;;  %418 = vmatprep.subr.mxu1 %v162_v26 }
  0xce   :  { %419 = vmatpush3.msra.mxu1 %v162_v26 }
  0xcf   :  { %420 = vmatprep.subr.mxu1 %v161_v30 }
  0xd0   :  { %421 = vmatpush3.msra.mxu1 %v161_v30 }
  0xd1   :  { %422 = vmatprep.subr.mxu1 %v160_v31 }
  0xd2   :  { %423 = vmatpush3.msra.mxu1 %v160_v31 }
  0xd3   :  { %424 = vmatprep.subr.mxu1 %v159_v32 }
  0xd4   :  { %425 = vmatpush3.msra.mxu1 %v159_v32 }
  0xd5   :  { %427 = vmatmul.mubr.msk.f32.vlgmr.msra.gmra.mxu1 %vm191_vm2, %v164_v33 }
  0xd6   :  { %429 = vmatprep.mubr.msk.f32.mxu1 %vm191_vm2, %v165_v34 }
  0xd9   :  { %430 = vmatmul.mubr.msk.f32.gmra.mxu1 %vm191_vm2, %v166_v35 }
 0x195   :  { %v428_v38 = vpop.f32.mrf.mxu1 }
 0x196   :  { %v276_v45 = vadd.f32 %v428_v38, %v179_v43 }
 0x197   :  { %v270_v40 = vpop.f32.mrf.mxu1 }
 0x198   :  { %v271_v49 = vadd.f32 %v270_v40, %v174_v48  ;;  %v290_v51 = vmax.f32 %v276_v45, 0.0 }
 0x199   :  { %v431_v41 = vpop.f32.mrf.mxu1 }
 0x19a   :  { %v286_v42 = vadd.f32 %v431_v41, %v189_v37  ;;  %v289_v52 = vmax.f32 %v271_v49, 0.0 }
 0x19b   :  { %v280_v44 = vpop.f32.mrf.mxu1 }
 0x19c   :  { %v292_v46 = vmax.f32 %v286_v42, 0.0  ;;  %v281_v47 = vadd.f32 %v280_v44, %v184_v39 }
 0x19e   :  { %v291_v50 = vmax.f32 %v281_v47, 0.0  ;;  %433 = vmatpush3.msra.mxu0 %v292_v46 }
 0x19f   :  { %434 = vmatprep.subr.mxu0 %v449_v36 }
 0x1a0   :  { %435 = vmatpush3.msra.mxu0 %v291_v50 }
 0x1a1   :  { %436 = vmatprep.subr.mxu0 %v449_v36 }
 0x1a2   :  { %437 = vmatpush3.msra.mxu0 %v290_v51 }
 0x1a3   :  { %438 = vmatprep.subr.mxu0 %v449_v36 }
 0x1a4   :  { %439 = vmatpush3.msra.mxu0 %v289_v52 }
 0x1a5   :  { %441 = vmatmul.mubr.msk.f32.vlgmr.msra.gmra.mxu0 %vm191_vm2, %v293_v53 }
 0x265   :  { %v373_v59 = vpop.f32.mrf.mxu0 }
 0x266   :  { %v374_v60 = vadd.f32 %v373_v59, %v303_v58 }
 0x267   :  { %v442_v61 = vpop.f32.mrf.mxu0 }
 0x268   :  { %377 = vst [vmem:[%s569_s7] sm:$0x1] %v374_v60 }

</bundles_post_ra>
